<compile_context>
chip_gen: v6e
topology: v6e:2x2x1
jax: 0.10.0
libtpu: 0.0.40
codegen_flags: <defaults>
</compile_context>

<pallas_src>
import functools

import jax
import jax.numpy as jnp
from jax import lax
from jax.experimental import pallas as pl
from jax.experimental.pallas import tpu as pltpu


def _round_up(x, m):
    return ((x + m - 1) // m) * m


def _vmem_capacity_bytes():
    """Per-TensorCore VMEM capacity; conservative fallback if unqueryable."""
    try:
        info = pltpu.get_tpu_info()
        cap = getattr(info, "vmem_capacity_bytes", None)
        if cap:
            return int(cap)
    except Exception:
        pass
    return 64 << 20  # v7x per-core VMEM (smallest current generation)


def _tile_budget():
    cap = _vmem_capacity_bytes()
    # Leave headroom for Mosaic internal scratch/semaphores: scoped limit is
    # capped below physical capacity, tile-selection budget at ~70% of it.
    limit_cap = cap - (8 << 20)   # ~56 MiB on v7x, ~120 MiB on v5e/v6e
    budget = int(cap * 0.70)      # ~44 MiB on v7x, ~89 MiB on v5e/v6e
    return budget, limit_cap


def _max_token_tile(budget):
    # Bigger token tiles only pay off where VMEM is plentiful (128 MiB parts).
    return 512 if budget >= (80 << 20) else 256


def _vocab_tile_candidates(budget):
    if budget >= (80 << 20):
        return (2048, 1024, 512, 256, 128)
    return (1024, 512, 256, 128)


def _select_vocab_tile(H, V, act_bytes, w_bytes, out_bytes):
    """Largest lane-dense (multiple-of-128) vocab tile whose double-buffered
    footprint fits the VMEM budget; V is padded up to a multiple of it."""
    budget, _ = _tile_budget()
    tm_max = _max_token_tile(budget)
    v_ceil = _round_up(V, 128)
    for cand in _vocab_tile_candidates(budget):
        tn = min(cand, v_ceil)
        footprint = 2 * (tm_max * H * act_bytes + tn * H * w_bytes + tm_max * tn * out_bytes)
        if footprint <= budget:
            return tn
    return 128


def prepare_lm_head_weight(weight, *, act_dtype, out_dtype=None, stream_dtype=None):
    """One-time (model-init) weight prep.  Do this OUTSIDE the jitted forward:
      * optional cast to a streaming dtype (e.g. bf16) to halve weight HBM
        traffic while keeping f32 MXU accumulation,
      * pad the vocab dim up to a multiple of the selected vocab tile so the
        hot path never re-pads the weight per call.
    Returns (prepared_weight, vocab_tile)."""
    V, H = weight.shape
    if stream_dtype is not None:
        weight = weight.astype(stream_dtype)
    out_dtype = out_dtype if out_dtype is not None else act_dtype
    tn = _select_vocab_tile(
        H, V,
        jnp.dtype(act_dtype).itemsize,
        jnp.dtype(weight.dtype).itemsize,
        jnp.dtype(out_dtype).itemsize,
    )
    V_pad = _round_up(V, tn)
    if V_pad != V:
        weight = jnp.pad(weight, ((0, V_pad - V), (0, 0)))
    return weight, tn


def _lm_head_kernel(x_ref, w_ref, o_ref):
    # x_ref : [tm, H]  token tile of flattened hidden states
    # w_ref : [tn, H]  vocab tile of the weight in native nn.Linear [V, H] layout
    # o_ref : [tm, tn]
    # Contract H with H (A . B^T): native MXU transposed-RHS path, no per-step
    # XLU transpose of the weight tile.
    o_ref[...] = lax.dot_general(
        x_ref[...],
        w_ref[...],
        dimension_numbers=(((1,), (1,)), ((), ())),
        preferred_element_type=jnp.float32,
    ).astype(o_ref.dtype)


@functools.partial(jax.jit, static_argnames=("vocab_size", "block_v", "out_dtype"))
def target_head_forward(hidden_states, weight, *, vocab_size=None, block_v=None,
                        out_dtype=None):
    """hidden_states: [..., H]; weight: [V_pad, H] (nn.Linear layout, no bias,
    ideally pre-padded via prepare_lm_head_weight).

    Returns logits [..., vocab_size] = hidden_states @ weight.T, computed
    without materializing weight.T and with the weight streamed from HBM
    exactly once per call.
    """
    *lead, H = hidden_states.shape
    V_w, H2 = weight.shape
    assert H == H2, "hidden dims of activations and lm_head weight must match"

    out_dtype = out_dtype if out_dtype is not None else hidden_states.dtype
    vocab_size = V_w if vocab_size is None else vocab_size

    act_bytes = jnp.dtype(hidden_states.dtype).itemsize
    w_bytes = jnp.dtype(weight.dtype).itemsize
    out_bytes = jnp.dtype(out_dtype).itemsize

    tn = block_v if block_v is not None else _select_vocab_tile(
        H, V_w, act_bytes, w_bytes, out_bytes)

    V_pad = _round_up(V_w, tn)
    w = weight
    if V_pad != V_w:
        # TODO(synk): slow path -- pad the lm_head weight offline via
        # prepare_lm_head_weight instead of paying a per-call HBM copy here.
        w = jnp.pad(weight, ((0, V_pad - V_w), (0, 0)))

    M = 1
    for d in lead:
        M *= d
    x = hidden_states.reshape(M, H)

    budget, limit_cap = _tile_budget()
    tm_max = _max_token_tile(budget)
    tm = _round_up(M, 8) if M <= tm_max else tm_max
    M_pad = _round_up(M, tm)
    if M_pad != M:
        x = jnp.pad(x, ((0, M_pad - M), (0, 0)))

    # Vocab axis OUTER (weight tile resident across the inner token loop,
    # fetched from HBM exactly once per call); token axis inner.
    grid = (V_pad // tn, M_pad // tm)

    footprint = 2 * (tm * H * act_bytes + tn * H * w_bytes + tm * tn * out_bytes)
    vmem_limit = int(min(max(footprint + (4 << 20), 16 << 20), limit_cap))

    cost = pl.CostEstimate(
        flops=2 * M_pad * H * V_pad,
        transcendentals=0,
        bytes_accessed=(M_pad * H * act_bytes
                        + V_pad * H * w_bytes
                        + M_pad * V_pad * out_bytes),
    )

    out = pl.pallas_call(
        _lm_head_kernel,
        out_shape=jax.ShapeDtypeStruct((M_pad, V_pad), out_dtype),
        grid_spec=pltpu.PrefetchScalarGridSpec(
            num_scalar_prefetch=0,
            grid=grid,
            in_specs=[
                # Activations re-stream across vocab passes (small).
                pl.BlockSpec((tm, H), lambda j, i: (i, 0)),
                # Weight tile resident across the inner token loop (large).
                # If decode profiles show exposed DMA latency, bump this spec
                # to pipeline_mode=pl.Buffered(3) where VMEM allows.
                pl.BlockSpec((tn, H), lambda j, i: (j, 0)),
            ],
            out_specs=pl.BlockSpec((tm, tn), lambda j, i: (i, j)),
        ),
        compiler_params=pltpu.CompilerParams(
            # Megacore shards the vocab axis -> each TensorCore reads a
            # disjoint slice of the weight; token axis stays sequential.
            dimension_semantics=("parallel", "arbitrary"),
            vmem_limit_bytes=vmem_limit,
        ),
        cost_estimate=cost,
    )(x, w)

    if M_pad != M or V_pad != vocab_size:
        out = out[:M, :vocab_size]
    return out.reshape(*lead, vocab_size)


def target_head_reference(hidden_states, weight):
    return jnp.einsum("...h,vh->...v", hidden_states, weight)


if __name__ == "__main__":
    key = jax.random.PRNGKey(0)
    kx, kw, kx2, kw2 = jax.random.split(key, 4)

    # Config 1: small aligned shapes (no padding path).
    B, S, H, V = 2, 8, 32, 256
    hidden_states = jax.random.normal(kx, (B, S, H), dtype=jnp.float32)
    weight = jax.random.normal(kw, (V, H), dtype=jnp.float32) * 0.02  # nn.Linear [V, H]

    # One-time (model-init) weight prep: pads V to the vocab tile.  f32
    # streaming here so the check against the f32 reference is tight; real
    # serving would pass stream_dtype=jnp.bfloat16 to halve weight traffic.
    w_prep, tn = prepare_lm_head_weight(weight, act_dtype=hidden_states.dtype)
    logits = target_head_forward(hidden_states, w_prep, vocab_size=V, block_v=tn)
    logits = jax.block_until_ready(logits)
    ref = target_head_reference(hidden_states, weight)
    assert logits.shape == (B, S, V)
    assert jnp.allclose(logits, ref, atol=1e-4, rtol=1e-4)

    # Config 2: ragged shapes exercise the token- and vocab-padding paths.
    B2, S2, H2, V2 = 1, 13, 32, 200
    hs2 = jax.random.normal(kx2, (B2, S2, H2), dtype=jnp.float32)
    w2 = jax.random.normal(kw2, (V2, H2), dtype=jnp.float32) * 0.02
    w2_prep, tn2 = prepare_lm_head_weight(w2, act_dtype=hs2.dtype)
    logits2 = jax.block_until_ready(
        target_head_forward(hs2, w2_prep, vocab_size=V2, block_v=tn2))
    ref2 = target_head_reference(hs2, w2)
    assert logits2.shape == (B2, S2, V2)
    assert jnp.allclose(logits2, ref2, atol=1e-4, rtol=1e-4)

    print("KERNEL_OK")
</pallas_src>

<mosaic_0001>
module attributes {stable_mosaic.version = 11 : i64} {
  func.func @_lm_head_kernel(%arg0: i32, %arg1: i32, %arg2: memref<16x32xf32, #tpu.memory_space<vmem>>, %arg3: memref<256x32xf32, #tpu.memory_space<vmem>>, %arg4: memref<16x256xf32, #tpu.memory_space<vmem>>) attributes {dimension_semantics = [#tpu.dimension_semantics<parallel>, #tpu.dimension_semantics<arbitrary>], iteration_bounds = array<i64: 1, 1>, scalar_prefetch = 0 : i64, scratch_operands = 0 : i64, tpu.core_type = #tpu.core_type<tc>, window_params = [{transform_indices = @transform_0, window_bounds = array<i64: 16, 32>}, {transform_indices = @transform_1, window_bounds = array<i64: 256, 32>}, {transform_indices = @transform_2, window_bounds = array<i64: 16, 256>}]} {
    %c0 = arith.constant 0 : index
    %c0_0 = arith.constant 0 : index
    %0 = vector.load %arg2[%c0, %c0_0] : memref<16x32xf32, #tpu.memory_space<vmem>>, vector<16x32xf32>
    %c0_1 = arith.constant 0 : index
    %c0_2 = arith.constant 0 : index
    %1 = vector.load %arg3[%c0_1, %c0_2] : memref<256x32xf32, #tpu.memory_space<vmem>>, vector<256x32xf32>
    %cst = arith.constant dense<0.000000e+00> : vector<16x256xf32>
    %2 = tpu.matmul %0, %1, %cst {dimension_numbers = #tpu.dot_dimension_numbers<[1], [1], [0], [0], [0, 0, 1, 0], [], []>} : vector<16x32xf32>, vector<256x32xf32>, vector<16x256xf32> -> vector<16x256xf32>
    %c0_3 = arith.constant 0 : index
    %c0_4 = arith.constant 0 : index
    %3 = vector.load %arg4[%c0_3, %c0_4] : memref<16x256xf32, #tpu.memory_space<vmem>>, vector<16x256xf32>
    tpu.vector_store %arg4[%c0_3, %c0_4], %2 {strides = array<i32>} : memref<16x256xf32, #tpu.memory_space<vmem>>, vector<16x256xf32>,
    return
  }
  func.func @transform_0(%arg0: i32, %arg1: i32) -> (i32, i32) {
    %c0_i32 = arith.constant 0 : i32
    %c0_i32_0 = arith.constant 0 : i32
    return %arg1, %c0_i32 : i32, i32
  }
  func.func @transform_1(%arg0: i32, %arg1: i32) -> (i32, i32) {
    %c0_i32 = arith.constant 0 : i32
    %c0_i32_0 = arith.constant 0 : i32
    return %arg0, %c0_i32 : i32, i32
  }
  func.func @transform_2(%arg0: i32, %arg1: i32) -> (i32, i32) {
    %c0_i32 = arith.constant 0 : i32
    return %arg1, %arg0 : i32, i32
  }
}

</mosaic_0001>

<bundles_post_ra>
// kernel: target_head_forward.1
= control target key start
LH: loop header
LB: loop body
LE: loop exit
PB: predicated region body
PF: predicated region fallthrough
CT: control target
= control target key end

     0   :  { %vm46_vm0 = vcmask 261120   ;;  %s572_s0 = inlined_call_operand.vmem [shape: f32[16,32], index: 0, kind: input, shape index: {}]   ;;  %s573_s1 = inlined_call_operand.vmem [shape: f32[256,32], index: 1, kind: input, shape index: {}]   ;;  %s574_s2 = inlined_call_operand.hbm [shape: f32[16,256], index: 2, kind: output, shape index: {}]  }
   0x1   :  { %v45_v0 = vld [vmem:[%s573_s1 + $0xf8] sm:$0xff]  ;;  %v44_v2 = vld [vmem:[%s573_s1 + $0xf0] sm:$0xff]  ;;  %v43_v4 = vld [vmem:[%s573_s1 + $0xe8] sm:$0xff] }
   0x2   :  { %v29_v1 = vld [vmem:[%s573_s1 + $0x78] sm:$0xff]  ;;  %280 = vmatprep.subr.msk.mxu0 %vm46_vm0, %v45_v0  ;;  %316 = vmatprep.subr.msk.mxu1 %vm46_vm0, %v45_v0  ;;  %v28_v3 = vld [vmem:[%s573_s1 + $0x70] sm:$0xff]  ;;  %v27_v5 = vld [vmem:[%s573_s1 + $0x68] sm:$0xff] }
   0x3   :  { %281 = vmatpush3.xpose.msk.msra.mxu0 %vm46_vm0, %v29_v1  ;;  %332 = vmatpush3.xpose.msk.msra.mxu1 %vm46_vm0, %v29_v1  ;;  %v42_v6 = vld [vmem:[%s573_s1 + $0xe0] sm:$0xff]  ;;  %v437_v9 = vld [vmem:[%s572_s0 + $0x8] sm:$0xff] }
   0x4   :  { %282 = vmatprep.subr.msk.mxu0 %vm46_vm0, %v44_v2  ;;  %317 = vmatprep.subr.msk.mxu1 %vm46_vm0, %v44_v2  ;;  %v427_v7 = vld [vmem:[%s572_s0] sm:$0xff] }
   0x5   :  { %v26_v8 = vld [vmem:[%s573_s1 + $0x60] sm:$0xff] }
   0x7   :  { %283 = vmatpush3.xpose.msk.msra.mxu0 %vm46_vm0, %v28_v3  ;;  %333 = vmatpush3.xpose.msk.msra.mxu1 %vm46_vm0, %v28_v3 }
   0x8   :  { %284 = vmatprep.subr.msk.mxu0 %vm46_vm0, %v43_v4  ;;  %318 = vmatprep.subr.msk.mxu1 %vm46_vm0, %v43_v4 }
   0xb   :  { %285 = vmatpush3.xpose.msk.msra.mxu0 %vm46_vm0, %v27_v5  ;;  %334 = vmatpush3.xpose.msk.msra.mxu1 %vm46_vm0, %v27_v5 }
   0xc   :  { %286 = vmatprep.subr.msk.mxu0 %vm46_vm0, %v42_v6  ;;  %319 = vmatprep.subr.msk.mxu1 %vm46_vm0, %v42_v6 }
   0xd   :  { %7 = vsyncpa [#allocation3], 0  ;;  %v41_v10 = vld [vmem:[%s573_s1 + $0xd8] sm:$0xff]  ;;  %312 = vmatprep.mubr.msk.f32.mxu0 %vm46_vm0, %v427_v7  ;;  %314 = vmatprep.mubr.msk.f32.mxu1 %vm46_vm0, %v437_v9  ;;  %v40_v12 = vld [vmem:[%s573_s1 + $0xd0] sm:$0xff]  ;;  %s373_s19 = smov [#allocation2]  }
   0xe   :  { %v25_v11 = vld [vmem:[%s573_s1 + $0x58] sm:$0xff]  ;;  %v24_v13 = vld [vmem:[%s573_s1 + $0x50] sm:$0xff]  ;;  %v39_v14 = vld [vmem:[%s573_s1 + $0xc8] sm:$0xff]  ;;  %s235_s20 = sshll.u32 %s373_s19, 4  ;;  %s236_s20 = int_to_ptr.vmem [resolvable:$true] %s235_s20 }
   0xf   :  { %287 = vmatpush3.xpose.msk.msra.mxu0 %vm46_vm0, %v26_v8  ;;  %335 = vmatpush3.xpose.msk.msra.mxu1 %vm46_vm0, %v26_v8  ;;  %v23_v15 = vld [vmem:[%s573_s1 + $0x48] sm:$0xff]  ;;  %v38_v16 = vld [vmem:[%s573_s1 + $0xc0] sm:$0xff]  ;;  %v37_v18 = vld [vmem:[%s573_s1 + $0xb8] sm:$0xff]  ;;  %p356_p1 = scmp.lt.s32.totalorder %s236_s20, %s236_s20 }
  0x10   :  { %288 = vmatprep.subr.msk.mxu0 %vm46_vm0, %v41_v10  ;;  %320 = vmatprep.subr.msk.mxu1 %vm46_vm0, %v41_v10  ;;  %v22_v17 = vld [vmem:[%s573_s1 + $0x40] sm:$0xff]  ;;  %v21_v19 = vld [vmem:[%s573_s1 + $0x38] sm:$0xff]  ;;  %v36_v20 = vld [vmem:[%s573_s1 + $0xb0] sm:$0xff] }
  0x11   :  { %v20_v21 = vld [vmem:[%s573_s1 + $0x30] sm:$0xff]  ;;  %v35_v22 = vld [vmem:[%s573_s1 + $0xa8] sm:$0xff]  ;;  %v34_v24 = vld [vmem:[%s573_s1 + $0xa0] sm:$0xff] }
  0x12   :  { %v19_v23 = vld [vmem:[%s573_s1 + $0x28] sm:$0xff]  ;;  %v18_v25 = vld [vmem:[%s573_s1 + $0x20] sm:$0xff]  ;;  %v33_v26 = vld [vmem:[%s573_s1 + $0x98] sm:$0xff] }
  0x13   :  { %289 = vmatpush3.xpose.msk.msra.mxu0 %vm46_vm0, %v25_v11  ;;  %336 = vmatpush3.xpose.msk.msra.mxu1 %vm46_vm0, %v25_v11  ;;  %v17_v27 = vld [vmem:[%s573_s1 + $0x18] sm:$0xff]  ;;  %v32_v28 = vld [vmem:[%s573_s1 + $0x90] sm:$0xff]  ;;  %v31_v30 = vld [vmem:[%s573_s1 + $0x88] sm:$0xff] }
  0x14   :  { %290 = vmatprep.subr.msk.mxu0 %vm46_vm0, %v40_v12  ;;  %321 = vmatprep.subr.msk.mxu1 %vm46_vm0, %v40_v12  ;;  %v16_v29 = vld [vmem:[%s573_s1 + $0x10] sm:$0xff]  ;;  %v15_v31 = vld [vmem:[%s573_s1 + $0x8] sm:$0xff]  ;;  %v30_v32 = vld [vmem:[%s573_s1 + $0x80] sm:$0xff] }
  0x15   :  { %v14_v33 = vld [vmem:[%s573_s1] sm:$0xff]  ;;  %s351_s1 = scalar_lea.vmem %s236_s20, 512 }
  0x16   :  { %p352_p0 = scmp.ne.s32.totalorder %s236_s20, %s351_s1  ;;  %p357_p2 = scmp.lt.s32.totalorder %s351_s1, %s351_s1 }
  0x17   :  { %291 = vmatpush3.xpose.msk.msra.mxu0 %vm46_vm0, %v24_v13  ;;  %337 = vmatpush3.xpose.msk.msra.mxu1 %vm46_vm0, %v24_v13 }
  0x18   :  { %292 = vmatprep.subr.msk.mxu0 %vm46_vm0, %v39_v14  ;;  %322 = vmatprep.subr.msk.mxu1 %vm46_vm0, %v39_v14  ;;  %p358_p3 = por %p357_p2, %p356_p1 }
  0x1a   :  { %p359_p4 = pnand %p358_p3, %p352_p0 }
  0x1b   :  { %293 = vmatpush3.xpose.msk.msra.mxu0 %vm46_vm0, %v23_v15  ;;  %338 = vmatpush3.xpose.msk.msra.mxu1 %vm46_vm0, %v23_v15 }
  0x1c   :  { %294 = vmatprep.subr.msk.mxu0 %vm46_vm0, %v38_v16  ;;  %323 = vmatprep.subr.msk.mxu1 %vm46_vm0, %v38_v16 }
  0x1f   :  { %295 = vmatpush3.xpose.msk.msra.mxu0 %vm46_vm0, %v22_v17  ;;  %339 = vmatpush3.xpose.msk.msra.mxu1 %vm46_vm0, %v22_v17 }
  0x20   :  { %296 = vmatprep.subr.msk.mxu0 %vm46_vm0, %v37_v18  ;;  %324 = vmatprep.subr.msk.mxu1 %vm46_vm0, %v37_v18 }
  0x23   :  { %297 = vmatpush3.xpose.msk.msra.mxu0 %vm46_vm0, %v21_v19  ;;  %340 = vmatpush3.xpose.msk.msra.mxu1 %vm46_vm0, %v21_v19 }
  0x24   :  { %298 = vmatprep.subr.msk.mxu0 %vm46_vm0, %v36_v20  ;;  %325 = vmatprep.subr.msk.mxu1 %vm46_vm0, %v36_v20 }
  0x27   :  { %299 = vmatpush3.xpose.msk.msra.mxu0 %vm46_vm0, %v20_v21  ;;  %341 = vmatpush3.xpose.msk.msra.mxu1 %vm46_vm0, %v20_v21 }
  0x28   :  { %300 = vmatprep.subr.msk.mxu0 %vm46_vm0, %v35_v22  ;;  %326 = vmatprep.subr.msk.mxu1 %vm46_vm0, %v35_v22 }
  0x2b   :  { %301 = vmatpush3.xpose.msk.msra.mxu0 %vm46_vm0, %v19_v23  ;;  %342 = vmatpush3.xpose.msk.msra.mxu1 %vm46_vm0, %v19_v23 }
  0x2c   :  { %302 = vmatprep.subr.msk.mxu0 %vm46_vm0, %v34_v24  ;;  %327 = vmatprep.subr.msk.mxu1 %vm46_vm0, %v34_v24 }
  0x2f   :  { %303 = vmatpush3.xpose.msk.msra.mxu0 %vm46_vm0, %v18_v25  ;;  %343 = vmatpush3.xpose.msk.msra.mxu1 %vm46_vm0, %v18_v25 }
  0x30   :  { %304 = vmatprep.subr.msk.mxu0 %vm46_vm0, %v33_v26  ;;  %328 = vmatprep.subr.msk.mxu1 %vm46_vm0, %v33_v26 }
  0x33   :  { %305 = vmatpush3.xpose.msk.msra.mxu0 %vm46_vm0, %v17_v27  ;;  %344 = vmatpush3.xpose.msk.msra.mxu1 %vm46_vm0, %v17_v27 }
  0x34   :  { %306 = vmatprep.subr.msk.mxu0 %vm46_vm0, %v32_v28  ;;  %329 = vmatprep.subr.msk.mxu1 %vm46_vm0, %v32_v28 }
  0x37   :  { %307 = vmatpush3.xpose.msk.msra.mxu0 %vm46_vm0, %v16_v29  ;;  %345 = vmatpush3.xpose.msk.msra.mxu1 %vm46_vm0, %v16_v29 }
  0x38   :  { %308 = vmatprep.subr.msk.mxu0 %vm46_vm0, %v31_v30  ;;  %330 = vmatprep.subr.msk.mxu1 %vm46_vm0, %v31_v30 }
  0x3b   :  { %309 = vmatpush3.xpose.msk.msra.mxu0 %vm46_vm0, %v15_v31  ;;  %346 = vmatpush3.xpose.msk.msra.mxu1 %vm46_vm0, %v15_v31 }
  0x3c   :  { %310 = vmatprep.subr.msk.mxu0 %vm46_vm0, %v30_v32  ;;  %331 = vmatprep.subr.msk.mxu1 %vm46_vm0, %v30_v32 }
  0x3f   :  { %311 = vmatpush3.xpose.msk.msra.mxu0 %vm46_vm0, %v14_v33  ;;  %347 = vmatpush3.xpose.msk.msra.mxu1 %vm46_vm0, %v14_v33 }
  0x42   :  { %313 = vmatmul.mubr.msk.f32.vlgmr.msra.gmra.mxu0 %vm46_vm0, %v427_v7  ;;  %315 = vmatmul.mubr.msk.f32.vlgmr.msra.gmra.mxu1 %vm46_vm0, %v437_v9 }
 0x102   :  { %v215_v34 = vpop.f32.mrf.mxu0  ;;  %v221_v35 = vpop.f32.mrf.mxu1 }
 0x103   :  { %226 = vst [vmem:[#allocation2] sm:$0xff] %v215_v34  ;;  %228 = vst [vmem:[#allocation2 + $0x10] sm:$0xff] %v221_v35 }
 0x104   :  { %v217_v36 = vpop.f32.mrf.mxu0  ;;  %v223_v37 = vpop.f32.mrf.mxu1 }
 0x105   :  { %227 = vst [vmem:[#allocation2 + $0x8] sm:$0xff] %v217_v36  ;;  %229 = vst [vmem:[#allocation2 + $0x18] sm:$0xff] %v223_v37 }
 0x106   :  { %362 = shalt.err (!%p359_p4)
}
 0x107   :  { %s374_s21 = smov 256   ;;  %s375_s22 = smov 16  }
 0x108   :  { %241 = dma.vmem_to_hbm [thread:$0]  %s236_s20, 512, %s574_s2, [#allocation3], %s374_s21, %s374_s21, %s375_s22  }
 0x109   :  { %371 = dma.done.wait [#allocation3], 512  }
 0x10a   :  { %372 = vsyncadd [#allocation3], 4294966784 }
 0x10b   :  { %245 = vsyncpa [#allocation3], 1 }

</bundles_post_ra>
